<compile_context>
chip_gen: v6e
topology: v6e:2x2x1
jax: 0.10.0
libtpu: 0.0.40
codegen_flags: <defaults>
</compile_context>

<pallas_src>
import math
import jax
import jax.numpy as jnp
from jax.experimental import pallas as pl
from jax.experimental.pallas import tpu as pltpu


def mapping_kernel(z_ref, c_ref, w0_ref, b0_ref, w1_ref, b1_ref, out_ref):
    z_dim = z_ref.shape[1]

    # normalize_2nd_moment(z, dim=1, eps=1e-8) in f32 (block spans the full feature axis).
    z = z_ref[...].astype(jnp.float32)
    ms = jnp.mean(z * z, axis=1, keepdims=True)
    x = z * jax.lax.rsqrt(ms + 1e-8)

    # Layer 0: FullyConnectedLayer, activation='lrelu'. Gains pre-folded into W0/b0;
    # the lrelu sqrt(2) act-gain is folded into W1, so only the slope-0.2 max remains.
    h = jnp.dot(x.astype(jnp.bfloat16), w0_ref[...],
                preferred_element_type=jnp.float32) + b0_ref[...]
    h = jnp.maximum(h, 0.2 * h)

    # Layer 1: FullyConnectedLayer, activation='linear' (linear_out=True).
    y = jnp.dot(h.astype(jnp.bfloat16), w1_ref[...],
                preferred_element_type=jnp.float32) + b1_ref[...]

    # Fused w = concat([x, c], dim=1): both writes are lane-aligned (z_dim % 128 == 0).
    out_ref[:, :z_dim] = y.astype(out_ref.dtype)
    out_ref[:, z_dim:] = c_ref[...].astype(out_ref.dtype)


def _pick_tile_n(n, max_tile=256):
    """Largest multiple of 8 that divides n and is <= max_tile (or n itself)."""
    if n % 8 != 0 or n <= 8:
        return n
    t = min(max_tile, n)
    t -= t % 8
    while n % t != 0:
        t -= 8
    return max(t, 8)


def _vmem_budget_bytes(tile_n, z_dim, c_dim):
    w_bytes = 2 * z_dim * z_dim * 2                      # two resident bf16 weight matrices
    b_bytes = 2 * z_dim * 4                              # two f32 bias rows
    io_bytes = 2 * tile_n * (z_dim + c_dim + (z_dim + c_dim)) * 4   # double-buffered z/c/out tiles
    est = 2 * w_bytes + b_bytes + io_bytes + (4 << 20)   # headroom for compiler scratch
    return int(min(64 << 20, max(8 << 20, est)))         # stay within v7x's 64 MiB physical VMEM


def fold_params(params):
    """One-time folding of StyleGAN FullyConnectedLayer runtime gains into the weights.

    weight_gain = lr_multiplier / sqrt(in_features); bias_gain = lr_multiplier;
    the lrelu act-gain sqrt(2) commutes with the second matmul and is folded into W1.
    Weights are transposed to [in, out] and cast to bf16; biases stay f32.
    """
    lr = params["lr_multiplier"]
    w0, w1 = params["w0"], params["w1"]                  # PyTorch layout [out, in]
    in0, in1 = w0.shape[1], w1.shape[1]
    return {
        "w0": (w0 * (lr / math.sqrt(in0))).T.astype(jnp.bfloat16),
        "w1": (w1 * (lr / math.sqrt(in1)) * math.sqrt(2.0)).T.astype(jnp.bfloat16),
        "b0": (params["b0"] * lr).reshape(1, -1).astype(jnp.float32),
        "b1": (params["b1"] * lr).reshape(1, -1).astype(jnp.float32),
    }


def mapping_network_forward(z, c, folded):
    """z: [N, z_dim] f32, c: [N, c_dim] f32 (already in latent space). Returns [N, z_dim + c_dim]."""
    n, z_dim = z.shape
    c_dim = c.shape[1]
    w_dim = z_dim + c_dim
    # Lane-dense fused concat requires the split point on a 128-lane boundary.
    assert z_dim % 128 == 0 and c_dim % 128 == 0, "pad z_dim/c_dim to multiples of 128"

    tile_n = _pick_tile_n(n)
    grid = (n // tile_n,)

    return pl.pallas_call(
        mapping_kernel,
        out_shape=jax.ShapeDtypeStruct((n, w_dim), jnp.float32),
        grid_spec=pl.GridSpec(
            grid=grid,
            in_specs=[
                pl.BlockSpec((tile_n, z_dim), lambda i: (i, 0)),   # z   (batch-tiled)
                pl.BlockSpec((tile_n, c_dim), lambda i: (i, 0)),   # c   (batch-tiled)
                pl.BlockSpec((z_dim, z_dim), lambda i: (0, 0)),    # W0  (resident, bf16, [in,out])
                pl.BlockSpec((1, z_dim), lambda i: (0, 0)),        # b0  (resident)
                pl.BlockSpec((z_dim, z_dim), lambda i: (0, 0)),    # W1  (resident, bf16, [in,out])
                pl.BlockSpec((1, z_dim), lambda i: (0, 0)),        # b1  (resident)
            ],
            out_specs=pl.BlockSpec((tile_n, w_dim), lambda i: (i, 0)),
        ),
        compiler_params=pltpu.CompilerParams(
            dimension_semantics=("parallel",),
            vmem_limit_bytes=_vmem_budget_bytes(tile_n, z_dim, c_dim),
        ),
    )(z, c, folded["w0"], folded["b0"], folded["w1"], folded["b1"])


def init_params(key, z_dim, lr_multiplier=0.01):
    # PyTorch FullyConnectedLayer init: weight ~ randn(out, in) / lr_multiplier, bias = 0.
    k0, k1 = jax.random.split(key)
    return {
        "w0": jax.random.normal(k0, (z_dim, z_dim), jnp.float32) / lr_multiplier,
        "b0": jnp.zeros((z_dim,), jnp.float32),
        "w1": jax.random.normal(k1, (z_dim, z_dim), jnp.float32) / lr_multiplier,
        "b1": jnp.zeros((z_dim,), jnp.float32),
        "lr_multiplier": lr_multiplier,
    }


def _reference_forward(z, c, params):
    """Pure-JAX f32 reference of the original PyTorch forward (eval mode)."""
    lr = params["lr_multiplier"]
    z_dim = z.shape[1]
    x = z * jax.lax.rsqrt(jnp.mean(z * z, axis=1, keepdims=True) + 1e-8)
    h = x @ (params["w0"] * (lr / math.sqrt(z_dim))).T + params["b0"] * lr
    h = jnp.where(h >= 0, h, 0.2 * h) * math.sqrt(2.0)
    y = h @ (params["w1"] * (lr / math.sqrt(z_dim))).T + params["b1"] * lr
    return jnp.concatenate([y, c], axis=1)


if __name__ == "__main__":
    key = jax.random.PRNGKey(0)
    kz, kc, kp = jax.random.split(key, 3)

    # Small but lane-dense / MXU-friendly shapes (real module: z_dim cfg, c_dim=768->pad).
    N, z_dim, c_dim = 16, 128, 128
    z = jax.random.normal(kz, (N, z_dim), jnp.float32)
    c = jax.random.normal(kc, (N, c_dim), jnp.float32)  # pre-encoded condition embedding

    params = init_params(kp, z_dim)
    folded = fold_params(params)  # one-time fold: no per-call weight rescale/transpose

    w = mapping_network_forward(z, c, folded)
    jax.block_until_ready(w)
    assert w.shape == (N, z_dim + c_dim)

    # Loose numerical check vs f32 reference (kernel uses bf16 weights on the MXU).
    w_ref = _reference_forward(z, c, params)
    assert bool(jnp.allclose(w, w_ref, rtol=1e-1, atol=1e-1)), "mismatch vs reference"

    print("KERNEL_OK")
</pallas_src>

<mosaic_0001>
module attributes {stable_mosaic.version = 11 : i64} {
  func.func @mapping_kernel(%arg0: i32, %arg1: memref<16x128xf32, #tpu.memory_space<vmem>>, %arg2: memref<16x128xf32, #tpu.memory_space<vmem>>, %arg3: memref<128x128xbf16, #tpu.memory_space<vmem>>, %arg4: memref<1x128xf32, #tpu.memory_space<vmem>>, %arg5: memref<128x128xbf16, #tpu.memory_space<vmem>>, %arg6: memref<1x128xf32, #tpu.memory_space<vmem>>, %arg7: memref<16x256xf32, #tpu.memory_space<vmem>>) attributes {dimension_semantics = [#tpu.dimension_semantics<parallel>], iteration_bounds = array<i64: 1>, scalar_prefetch = 0 : i64, scratch_operands = 0 : i64, tpu.core_type = #tpu.core_type<tc>, window_params = [{transform_indices = @transform_0, window_bounds = array<i64: 16, 128>}, {transform_indices = @transform_1, window_bounds = array<i64: 16, 128>}, {pipeline_mode = #tpu.pipeline_mode<synchronous>, transform_indices = @transform_2, window_bounds = array<i64: 128, 128>}, {pipeline_mode = #tpu.pipeline_mode<synchronous>, transform_indices = @transform_3, window_bounds = array<i64: 1, 128>}, {pipeline_mode = #tpu.pipeline_mode<synchronous>, transform_indices = @transform_4, window_bounds = array<i64: 128, 128>}, {pipeline_mode = #tpu.pipeline_mode<synchronous>, transform_indices = @transform_5, window_bounds = array<i64: 1, 128>}, {transform_indices = @transform_6, window_bounds = array<i64: 16, 256>}]} {
    %c0 = arith.constant 0 : index
    %c0_0 = arith.constant 0 : index
    %0 = vector.load %arg1[%c0, %c0_0] : memref<16x128xf32, #tpu.memory_space<vmem>>, vector<16x128xf32>
    %1 = arith.mulf %0, %0 : vector<16x128xf32>
    %cst = arith.constant dense<0.000000e+00> : vector<16xf32>
    %2 = vector.multi_reduction <add>, %1, %cst [1] : vector<16x128xf32> to vector<16xf32>
    %3 = vector.shape_cast %2 : vector<16xf32> to vector<16x1xf32>
    %cst_1 = arith.constant 1.280000e+02 : f32
    %4 = vector.broadcast %cst_1 : f32 to vector<16x1xf32>
    %5 = arith.divf %3, %4 : vector<16x1xf32>
    %cst_2 = arith.constant 9.99999993E-9 : f32
    %6 = vector.broadcast %cst_2 : f32 to vector<16x1xf32>
    %7 = arith.addf %5, %6 : vector<16x1xf32>
    %8 = math.rsqrt %7 : vector<16x1xf32>
    %9 = vector.broadcast %8 : vector<16x1xf32> to vector<16x128xf32>
    %10 = arith.mulf %0, %9 : vector<16x128xf32>
    %11 = arith.truncf %10 : vector<16x128xf32> to vector<16x128xbf16>
    %c0_3 = arith.constant 0 : index
    %c0_4 = arith.constant 0 : index
    %12 = vector.load %arg3[%c0_3, %c0_4] : memref<128x128xbf16, #tpu.memory_space<vmem>>, vector<128x128xbf16>
    %cst_5 = arith.constant dense<0.000000e+00> : vector<16x128xf32>
    %13 = tpu.matmul %11, %12, %cst_5 {dimension_numbers = #tpu.dot_dimension_numbers<[1], [0], [0], [1], [0, 0, 1, 1], [], []>} : vector<16x128xbf16>, vector<128x128xbf16>, vector<16x128xf32> -> vector<16x128xf32>
    %c0_6 = arith.constant 0 : index
    %c0_7 = arith.constant 0 : index
    %14 = vector.load %arg4[%c0_6, %c0_7] : memref<1x128xf32, #tpu.memory_space<vmem>>, vector<1x128xf32>
    %15 = vector.broadcast %14 : vector<1x128xf32> to vector<16x128xf32>
    %16 = arith.addf %13, %15 : vector<16x128xf32>
    %cst_8 = arith.constant 2.000000e-01 : f32
    %17 = vector.broadcast %cst_8 : f32 to vector<16x128xf32>
    %18 = arith.mulf %17, %16 : vector<16x128xf32>
    %19 = arith.maximumf %16, %18 : vector<16x128xf32>
    %20 = arith.truncf %19 : vector<16x128xf32> to vector<16x128xbf16>
    %c0_9 = arith.constant 0 : index
    %c0_10 = arith.constant 0 : index
    %21 = vector.load %arg5[%c0_9, %c0_10] : memref<128x128xbf16, #tpu.memory_space<vmem>>, vector<128x128xbf16>
    %cst_11 = arith.constant dense<0.000000e+00> : vector<16x128xf32>
    %22 = tpu.matmul %20, %21, %cst_11 {dimension_numbers = #tpu.dot_dimension_numbers<[1], [0], [0], [1], [0, 0, 1, 1], [], []>} : vector<16x128xbf16>, vector<128x128xbf16>, vector<16x128xf32> -> vector<16x128xf32>
    %c0_12 = arith.constant 0 : index
    %c0_13 = arith.constant 0 : index
    %23 = vector.load %arg6[%c0_12, %c0_13] : memref<1x128xf32, #tpu.memory_space<vmem>>, vector<1x128xf32>
    %24 = vector.broadcast %23 : vector<1x128xf32> to vector<16x128xf32>
    %25 = arith.addf %22, %24 : vector<16x128xf32>
    %c0_14 = arith.constant 0 : index
    %c0_15 = arith.constant 0 : index
    %26 = vector.load %arg7[%c0_14, %c0_15] : memref<16x256xf32, #tpu.memory_space<vmem>>, vector<16x128xf32>
    tpu.vector_store %arg7[%c0_14, %c0_15], %25 {strides = array<i32>} : memref<16x256xf32, #tpu.memory_space<vmem>>, vector<16x128xf32>,
    %c0_16 = arith.constant 0 : index
    %c0_17 = arith.constant 0 : index
    %27 = vector.load %arg2[%c0_16, %c0_17] : memref<16x128xf32, #tpu.memory_space<vmem>>, vector<16x128xf32>
    %c0_18 = arith.constant 0 : index
    %c128 = arith.constant 128 : index
    %28 = vector.load %arg7[%c0_18, %c128] : memref<16x256xf32, #tpu.memory_space<vmem>>, vector<16x128xf32>
    tpu.vector_store %arg7[%c0_18, %c128], %27 {strides = array<i32>} : memref<16x256xf32, #tpu.memory_space<vmem>>, vector<16x128xf32>,
    return
  }
  func.func @transform_0(%arg0: i32) -> (i32, i32) {
    %c0_i32 = arith.constant 0 : i32
    %c0_i32_0 = arith.constant 0 : i32
    return %arg0, %c0_i32 : i32, i32
  }
  func.func @transform_1(%arg0: i32) -> (i32, i32) {
    %c0_i32 = arith.constant 0 : i32
    %c0_i32_0 = arith.constant 0 : i32
    return %arg0, %c0_i32 : i32, i32
  }
  func.func @transform_2(%arg0: i32) -> (i32, i32) {
    %c0_i32 = arith.constant 0 : i32
    %c0_i32_0 = arith.constant 0 : i32
    %c0_i32_1 = arith.constant 0 : i32
    return %c0_i32, %c0_i32_0 : i32, i32
  }
  func.func @transform_3(%arg0: i32) -> (i32, i32) {
    %c0_i32 = arith.constant 0 : i32
    %c0_i32_0 = arith.constant 0 : i32
    %c0_i32_1 = arith.constant 0 : i32
    return %c0_i32, %c0_i32_0 : i32, i32
  }
  func.func @transform_4(%arg0: i32) -> (i32, i32) {
    %c0_i32 = arith.constant 0 : i32
    %c0_i32_0 = arith.constant 0 : i32
    %c0_i32_1 = arith.constant 0 : i32
    return %c0_i32, %c0_i32_0 : i32, i32
  }
  func.func @transform_5(%arg0: i32) -> (i32, i32) {
    %c0_i32 = arith.constant 0 : i32
    %c0_i32_0 = arith.constant 0 : i32
    %c0_i32_1 = arith.constant 0 : i32
    return %c0_i32, %c0_i32_0 : i32, i32
  }
  func.func @transform_6(%arg0: i32) -> (i32, i32) {
    %c0_i32 = arith.constant 0 : i32
    %c0_i32_0 = arith.constant 0 : i32
    return %arg0, %c0_i32 : i32, i32
  }
}

</mosaic_0001>

<bundles_post_ra>
// kernel: tpu_custom_call.1
= control target key start
LH: loop header
LB: loop body
LE: loop exit
PB: predicated region body
PF: predicated region fallthrough
CT: control target
= control target key end

     0   :  { %11 = vsyncpa [#allocation3], 0  ;;  %s656_s0 = inlined_call_operand.hbm [shape: f32[16,128], index: 0, kind: input, shape index: {}]   ;;  %s657_s1 = inlined_call_operand.hbm [shape: f32[16,128], index: 1, kind: input, shape index: {}]   ;;  %s658_s2 = inlined_call_operand.hbm [shape: bf16[128,128], index: 2, kind: input, shape index: {}]   ;;  %s659_s3 = inlined_call_operand.vmem [shape: f32[1,128], index: 3, kind: input, shape index: {}]   ;;  %s660_s4 = inlined_call_operand.hbm [shape: bf16[128,128], index: 4, kind: input, shape index: {}]   ;;  %s661_s5 = inlined_call_operand.vmem [shape: f32[1,128], index: 5, kind: input, shape index: {}]   ;;  %s662_s6 = inlined_call_operand.hbm [shape: f32[16,256], index: 6, kind: output, shape index: {}]  }
   0x1   :  { %12 = vsyncpa [#allocation6], 0 }
   0x2   :  { %13 = vsyncpa [#allocation9], 0 }
   0x3   :  { %14 = vsyncpa [#allocation4], 0  ;;  %s569_s21 = smov [#allocation5]   ;;  %s570_s23 = smov [#allocation2]  }
   0x4   :  { %s32_s22 = sshll.u32 %s569_s21, 4  ;;  %s20_s24 = sshll.u32 %s570_s23, 4  ;;  %s33_s22 = int_to_ptr.vmem [resolvable:$true] %s32_s22  ;;  %s21_s24 = int_to_ptr.vmem [resolvable:$true] %s20_s24 }
   0x5   :  { %s469_s25 = scalar_lea.vmem %s33_s22, 256  ;;  %p474_p1 = scmp.lt.s32.totalorder %s33_s22, %s33_s22 }
   0x6   :  { %p470_p0 = scmp.ne.s32.totalorder %s33_s22, %s469_s25  ;;  %p475_p2 = scmp.lt.s32.totalorder %s469_s25, %s469_s25 }
   0x8   :  { %p476_p3 = por %p475_p2, %p474_p1 }
   0xa   :  { %p477_p4 = pnand %p476_p3, %p470_p0 }
   0xc   :  { %480 = shalt.err (!%p477_p4)
}
   0xd   :  { %s571_s26 = smov 128   ;;  %s572_s27 = smov 8  }
   0xe   :  { %38 = dma.hbm_to_vmem [thread:$0]  %s657_s1, 256, %s33_s22, [#allocation6], %s571_s26, %s571_s26, %s572_s27  }
   0xf   :  { %s489_s30 = scalar_lea.vmem %s21_s24, 256  ;;  %p494_p6 = scmp.lt.s32.totalorder %s21_s24, %s21_s24 }
  0x10   :  { %p490_p5 = scmp.ne.s32.totalorder %s21_s24, %s489_s30  ;;  %p495_p7 = scmp.lt.s32.totalorder %s489_s30, %s489_s30 }
  0x12   :  { %p496_p8 = por %p495_p7, %p494_p6 }
  0x14   :  { %p497_p9 = pnand %p496_p8, %p490_p5 }
  0x16   :  { %500 = shalt.err (!%p497_p9)
}
  0x17   :  { %26 = dma.hbm_to_vmem [thread:$0]  %s656_s0, 256, %s21_s24, [#allocation3], %s571_s26, %s571_s26, %s572_s27  }
  0x18   :  { %s573_s9 = smov [#allocation7]  }
  0x19   :  { %s44_s10 = sshll.u32 %s573_s9, 4  ;;  %s45_s10 = int_to_ptr.vmem [resolvable:$true] %s44_s10 }
  0x1a   :  { %s509_s11 = scalar_lea.vmem %s45_s10, 1024  ;;  %p514_p11 = scmp.lt.s32.totalorder %s45_s10, %s45_s10 }
  0x1b   :  { %p510_p10 = scmp.ne.s32.totalorder %s45_s10, %s509_s11  ;;  %p515_p12 = scmp.lt.s32.totalorder %s509_s11, %s509_s11 }
  0x1d   :  { %p516_p13 = por %p515_p12, %p514_p11 }
  0x1f   :  { %p517_p0 = pnand %p516_p13, %p510_p10 }
  0x21   :  { %520 = shalt.err (!%p517_p0)
}
  0x22   :  { %s574_s1 = smov 64   ;;  %s575_s12 = smov 4  }
  0x23   :  { %50 = dma.hbm_to_vmem [thread:$0]  %s658_s2, 1024, %s45_s10, [#allocation6], %s574_s1, %s574_s1, %s575_s12  }
  0x24   :  { %s576_s15 = smov [#allocation8]  }
  0x25   :  { %s58_s16 = sshll.u32 %s576_s15, 4  ;;  %s59_s16 = int_to_ptr.vmem [resolvable:$true] %s58_s16 }
  0x26   :  { %s529_s0 = scalar_lea.vmem %s59_s16, 1024  ;;  %p534_p2 = scmp.lt.s32.totalorder %s59_s16, %s59_s16 }
  0x27   :  { %p530_p1 = scmp.ne.s32.totalorder %s59_s16, %s529_s0  ;;  %p535_p3 = scmp.lt.s32.totalorder %s529_s0, %s529_s0 }
  0x29   :  { %p536_p4 = por %p535_p3, %p534_p2 }
  0x2b   :  { %p537_p5 = pnand %p536_p4, %p530_p1 }
  0x2d   :  { %540 = shalt.err (!%p537_p5)
}
  0x2e   :  { %64 = dma.hbm_to_vmem [thread:$0]  %s660_s4, 1024, %s59_s16, [#allocation9], %s574_s1, %s574_s1, %s575_s12  }
  0x2f   :  { %561 = dma.done.wait [#allocation3], 256  }
  0x30   :  { %562 = vsyncadd [#allocation3], 4294967040 }
  0x31   :  { %563 = dma.done.wait [#allocation6], 1280  }
  0x32   :  { %564 = vsyncadd [#allocation6], 4294966016 }
  0x33   :  { %565 = dma.done.wait [#allocation9], 1024  }
  0x34   :  { %566 = vsyncadd [#allocation9], 4294966272  ;;  %v577_v0 = vmov 0.0   ;;  %v80_v1 = vld [vmem:[#allocation2] sm:$0xff]  ;;  %v81_v2 = vld [vmem:[#allocation2 + $0x8] sm:$0xff]  ;;  %vm578_vm0 = vmmov 0  }
  0x35   :  { %388 = vmatprep.subr.bf16.mxu0 %v577_v0  ;;  %408 = vmatprep.subr.bf16.mxu1 %v577_v0  ;;  %v82_v3 = vmul.f32 %v80_v1, %v80_v1  ;;  %v441_v4 = vld [vmem:[#allocation7 + $0x38] sm:$0xff]   ;;  %v442_v5 = vld [vmem:[#allocation7 + $0x30] sm:$0xff]   ;;  %v83_v6 = vmul.f32 %v81_v2, %v81_v2  ;;  %v443_v7 = vld [vmem:[#allocation7 + $0x28] sm:$0xff]  }
  0x36   :  { %389 = vmatpush3.bf16.msra.mxu0 %v441_v4  ;;  %v444_v8 = vld [vmem:[#allocation7 + $0x20] sm:$0xff]   ;;  %v445_v9 = vld [vmem:[#allocation7 + $0x18] sm:$0xff]   ;;  %404 = vmatprep.mubr.msk.bf16.mxu0 %vm578_vm0, %v577_v0  ;;  %v446_v10 = vld [vmem:[#allocation7 + $0x10] sm:$0xff]  }
  0x37   :  { %84 = vadd.xlane.f32.xlu0 %v82_v3  ;;  %390 = vmatprep.subr.bf16.mxu0 %v577_v0  ;;  %v447_v11 = vld [vmem:[#allocation7 + $0x8] sm:$0xff]   ;;  %v448_v12 = vld [vmem:[#allocation7] sm:$0xff]   ;;  %v449_v13 = vld [vmem:[#allocation8 + $0x38] sm:$0xff]  }
  0x38   :  { %424 = vmatprep.mubr.msk.bf16.mxu1 %vm578_vm0, %v577_v0  ;;  %409 = vmatpush3.bf16.msra.mxu1 %v449_v13  ;;  %v450_v14 = vld [vmem:[#allocation8 + $0x30] sm:$0xff]   ;;  %v451_v15 = vld [vmem:[#allocation8 + $0x28] sm:$0xff]   ;;  %v452_v16 = vld [vmem:[#allocation8 + $0x20] sm:$0xff]  }
  0x39   :  { %410 = vmatprep.subr.bf16.mxu1 %v577_v0  ;;  %v453_v17 = vld [vmem:[#allocation8 + $0x18] sm:$0xff]   ;;  %v454_v29 = vld [vmem:[#allocation8 + $0x10] sm:$0xff]   ;;  %v455_v30 = vld [vmem:[#allocation8 + $0x8] sm:$0xff]  }
  0x3a   :  { %391 = vmatpush3.bf16.msra.mxu0 %v442_v5  ;;  %v456_v31 = vld [vmem:[#allocation8] sm:$0xff]   ;;  %v329_v44 = vld [vmem:[#allocation5] sm:$0xff]  ;;  %v330_v45 = vld [vmem:[#allocation5 + $0x8] sm:$0xff] }
  0x3b   :  { %86 = vadd.xlane.f32.xlu0 %v83_v6  ;;  %392 = vmatprep.subr.bf16.mxu0 %v577_v0  ;;  %v352_v32 = vld [vmem:[%s659_s3] ss:$0 sm:$0xff]  ;;  %331 = vst [vmem:[#allocation10 + $0x8] sm:$0xff] %v329_v44  ;;  %332 = vst [vmem:[#allocation10 + $0x18] sm:$0xff] %v330_v45  ;;  %s579_s3 = smov [#allocation10]  }
  0x3c   :  { %411 = vmatpush3.bf16.msra.mxu1 %v450_v14  ;;  %v361_v46 = vld [vmem:[%s661_s5] ss:$0 sm:$0xff]  ;;  %s338_s21 = sshll.u32 %s579_s3, 4  ;;  %s339_s21 = int_to_ptr.vmem [resolvable:$true] %s338_s21 }
  0x3d   :  { %412 = vmatprep.subr.bf16.mxu1 %v577_v0  ;;  %s541_s22 = scalar_lea.vmem %s339_s21, 512  ;;  %p546_p7 = scmp.lt.s32.totalorder %s339_s21, %s339_s21 }
  0x3e   :  { %393 = vmatpush3.bf16.msra.mxu0 %v443_v7  ;;  %p542_p6 = scmp.ne.s32.totalorder %s339_s21, %s541_s22  ;;  %p547_p8 = scmp.lt.s32.totalorder %s541_s22, %s541_s22 }
  0x3f   :  { %394 = vmatprep.subr.bf16.mxu0 %v577_v0 }
  0x40   :  { %413 = vmatpush3.bf16.msra.mxu1 %v451_v15  ;;  %p548_p9 = por %p547_p8, %p546_p7 }
  0x41   :  { %414 = vmatprep.subr.bf16.mxu1 %v577_v0 }
  0x42   :  { %395 = vmatpush3.bf16.msra.mxu0 %v444_v8  ;;  %p549_p10 = pnand %p548_p9, %p542_p6 }
  0x43   :  { %396 = vmatprep.subr.bf16.mxu0 %v577_v0 }
  0x44   :  { %415 = vmatpush3.bf16.msra.mxu1 %v452_v16 }
  0x45   :  { %416 = vmatprep.subr.bf16.mxu1 %v577_v0 }
  0x46   :  { %397 = vmatpush3.bf16.msra.mxu0 %v445_v9 }
  0x47   :  { %398 = vmatprep.subr.bf16.mxu0 %v577_v0 }
  0x48   :  { %417 = vmatpush3.bf16.msra.mxu1 %v453_v17 }
  0x49   :  { %418 = vmatprep.subr.bf16.mxu1 %v577_v0 }
  0x4a   :  { %399 = vmatpush3.bf16.msra.mxu0 %v446_v10 }
  0x4b   :  { %400 = vmatprep.subr.bf16.mxu0 %v577_v0 }
  0x4c   :  { %419 = vmatpush3.bf16.msra.mxu1 %v454_v29 }
  0x4d   :  { %420 = vmatprep.subr.bf16.mxu1 %v577_v0 }
  0x4e   :  { %401 = vmatpush3.bf16.msra.mxu0 %v447_v11 }
  0x4f   :  { %402 = vmatprep.subr.bf16.mxu0 %v577_v0 }
  0x50   :  { %421 = vmatpush3.bf16.msra.mxu1 %v455_v30 }
  0x51   :  { %422 = vmatprep.subr.bf16.mxu1 %v577_v0 }
  0x52   :  { %403 = vmatpush3.bf16.msra.mxu0 %v448_v12 }
  0x54   :  { %423 = vmatpush3.bf16.msra.mxu1 %v456_v31 }
  0xc0   :  { %v85_v18 = vpop.xlane.xlu0 %84 }
  0xc1   :  { %v89_v19 = vmul.f32 0.0078125, %v85_v18 }
  0xc3   :  { %v91_v20 = vadd.f32 1e-08, %v89_v19 }
  0xc4   :  { %v87_v21 = vpop.xlane.xlu0 %86 }
  0xc5   :  { %v90_v22 = vmul.f32 0.0078125, %v87_v21  ;;  %457 = vrsqrt.f32 %v91_v20 }
  0xc7   :  { %v92_v23 = vadd.f32 1e-08, %v90_v22 }
  0xc9   :  { %459 = vrsqrt.f32 %v92_v23 }
  0xd2   :  { %v458_v24 = vpop.eup %457 }
  0xd3   :  { %v95_v26 = vmul.f32 %v458_v24, %v80_v1 }
  0xd6   :  { %v460_v25 = vpop.eup %459 }
  0xd7   :  { %v96_v27 = vmul.f32 %v460_v25, %v81_v2 }
  0xd9   :  { %v97_v28 = vpack.c.bf16 %v96_v27, %v95_v26 }
  0xdb   :  { %405 = vmatmul.mubr.bf16.vlgmr.msra.gmra.mxu0 %v97_v28 }
 0x19b   :  { %v203_v33 = vpop.f32.mrf.mxu0 }
 0x19c   :  { %v204_v34 = vadd.f32 %v352_v32, %v203_v33 }
 0x19d   :  { %v406_v35 = vpop.f32.mrf.mxu0 }
 0x19e   :  { %v210_v37 = vmul.f32 0.2, %v204_v34 }
 0x19f   :  { %v206_v36 = vpop.f32.mrf.mxu0 }
 0x1a0   :  { %v207_v38 = vadd.f32 %v352_v32, %v206_v36  ;;  %v212_v41 = vmax.f32 %v204_v34, %v210_v37 }
 0x1a1   :  { %v407_v39 = vpop.f32.mrf.mxu0 }
 0x1a2   :  { %v211_v40 = vmul.f32 0.2, %v207_v38 }
 0x1a4   :  { %v213_v42 = vmax.f32 %v207_v38, %v211_v40 }
 0x1a6   :  { %v214_v43 = vpack.c.bf16 %v213_v42, %v212_v41 }
 0x1a8   :  { %425 = vmatmul.mubr.bf16.vlgmr.msra.gmra.mxu1 %v214_v43 }
 0x268   :  { %v320_v47 = vpop.f32.mrf.mxu1 }
 0x269   :  { %v321_v48 = vadd.f32 %v361_v46, %v320_v47 }
 0x26a   :  { %v426_v49 = vpop.f32.mrf.mxu1 }
 0x26b   :  { %327 = vst [vmem:[#allocation10] sm:$0xff] %v321_v48 }
 0x26c   :  { %v323_v50 = vpop.f32.mrf.mxu1 }
 0x26d   :  { %v324_v51 = vadd.f32 %v361_v46, %v323_v50 }
 0x26e   :  { %v427_v52 = vpop.f32.mrf.mxu1 }
 0x26f   :  { %328 = vst [vmem:[#allocation10 + $0x10] sm:$0xff] %v324_v51 }
 0x270   :  { %552 = shalt.err (!%p549_p10)
}
 0x271   :  { %s580_s23 = smov 256   ;;  %s581_s5 = smov 16  }
 0x272   :  { %344 = dma.vmem_to_hbm [thread:$0]  %s339_s21, 512, %s662_s6, [#allocation4], %s580_s23, %s580_s23, %s581_s5  }
 0x273   :  { %567 = dma.done.wait [#allocation4], 512  }
 0x274   :  { %568 = vsyncadd [#allocation4], 4294966784 }
 0x275   :  { %348 = vsyncpa [#allocation3], 1 }
 0x276   :  { %349 = vsyncpa [#allocation6], 1 }
 0x277   :  { %350 = vsyncpa [#allocation9], 1 }
 0x278   :  { %351 = vsyncpa [#allocation4], 1 }

</bundles_post_ra>
